<compile_context>
chip_gen: v6e
topology: v6e:2x2x1
jax: 0.10.0
libtpu: 0.0.40
codegen_flags: <defaults>
</compile_context>

<pallas_src>
import jax
import jax.numpy as jnp
from jax import lax
from jax.experimental import pallas as pl
from jax.experimental.pallas import tpu as pltpu


def _round_up(x, m):
    return ((x + m - 1) // m) * m


def _vmem_limit(nbytes):
    # Actual footprint + 25% + 1 MiB headroom, clamped to [4 MiB, 48 MiB] (v7x-safe).
    return int(min(max(nbytes + nbytes // 4 + (1 << 20), 4 << 20), 48 << 20))


def _select_tiles(b, c, hw, itemsize, hw_tile_req):
    """Pick (b_tile, hw_tile).  Prefer lane-wide tiles (>=512 when possible), shrink the
    batch tile first, and prefer >=2 batch blocks so v7x's 2 TensorCores get work."""
    lane = 128
    hw_ceil = _round_up(hw, lane)
    budget = 24 * 1024 * 1024  # combined streamed footprint budget (fits v7x scoped VMEM)

    if hw_tile_req is not None:
        hw_tile = max(lane, (hw_tile_req // lane) * lane)
    else:
        hw_tile = min(hw_ceil, 1024)
    hw_tile = min(hw_tile, hw_ceil)

    cands = [d for d in range(min(b, 8), 0, -1) if b % d == 0]
    prefer = [d for d in cands if d <= max(1, b // 2)] or cands
    b_tile = prefer[0]

    def footprint(bt, ht):
        # K4 dominates: double-buffered x in + out, plus sa + scale.
        return 4 * bt * c * ht * itemsize + 2 * bt * ht * 4 + 2 * bt * c * 4

    while footprint(b_tile, hw_tile) > budget and b_tile > 1:
        smaller = [d for d in cands if d < b_tile]
        if not smaller:
            break
        b_tile = smaller[0]
    while footprint(b_tile, hw_tile) > budget and hw_tile > 512:
        hw_tile = max(512, ((hw_tile // 2) // lane) * lane)
    while footprint(b_tile, hw_tile) > budget and hw_tile > lane:
        hw_tile = max(lane, ((hw_tile // 2) // lane) * lane)
    return b_tile, hw_tile


# ---------------------------------------------------------------------------
# K1: channel-attention scale  (global avg/max pool over HW + shared MLP + sigmoid)
# ---------------------------------------------------------------------------
def _make_ca_scale_kernel(hw_valid, masked):
    inv_hw = 1.0 / float(hw_valid)

    def kernel(x_ref, w1_ref, w2_ref, o_ref, sum_acc, max_acc):
        k = pl.program_id(1)
        n_k = pl.num_programs(1)
        xf = x_ref[...].astype(jnp.float32)            # (b_t, C, hw_t)

        @pl.when(k == 0)
        def _():
            sum_acc[...] = jnp.zeros(sum_acc.shape, jnp.float32)
            max_acc[...] = jnp.full(max_acc.shape, -jnp.inf, jnp.float32)

        # Padded lanes are zero (wrapper zero-pads) -> no mask needed for the sum.
        sum_acc[...] = sum_acc[...] + jnp.sum(xf, axis=-1)

        if masked:
            # Only the last HW tile is partial; keep the steady-state path mask-free.
            @pl.when(k < n_k - 1)
            def _():
                max_acc[...] = jnp.maximum(max_acc[...], jnp.max(xf, axis=-1))
        else:
            max_acc[...] = jnp.maximum(max_acc[...], jnp.max(xf, axis=-1))

        @pl.when(k == n_k - 1)
        def _():
            if masked:
                hw_t = xf.shape[-1]
                lane = lax.broadcasted_iota(jnp.int32, xf.shape, 2)
                xm = jnp.where((k * hw_t + lane) < hw_valid, xf, -jnp.inf)
                mx = jnp.maximum(max_acc[...], jnp.max(xm, axis=-1))       # (b_t, C)
            else:
                mx = max_acc[...]
            avg = sum_acc[...] * inv_hw                                    # (b_t, C)
            v = jnp.concatenate([avg, mx], axis=0)                         # (2*b_t, C)
            w1 = w1_ref[...].astype(jnp.float32)                           # (Cr, C)
            w2 = w2_ref[...].astype(jnp.float32)                           # (C, Cr)
            # fc(v) = relu(v @ w1^T) @ w2^T, transposes folded into dot_general.
            h = lax.dot_general(v, w1, (((1,), (1,)), ((), ())),
                                preferred_element_type=jnp.float32)        # (2*b_t, Cr)
            h = jnp.maximum(h, 0.0)
            y = lax.dot_general(h, w2, (((1,), (1,)), ((), ())),
                                preferred_element_type=jnp.float32)        # (2*b_t, C)
            bt = avg.shape[0]
            logits = y[:bt] + y[bt:]
            o_ref[...] = (1.0 / (1.0 + jnp.exp(-logits)))[:, :, None].astype(o_ref.dtype)

    return kernel


# ---------------------------------------------------------------------------
# K2: channel-wise mean/max pooling of x_ca = scale * x (x_ca never hits HBM)
# ---------------------------------------------------------------------------
def _pool_ca_kernel(x_ref, s_ref, avg_ref, max_ref):
    x = x_ref[...].astype(jnp.float32)                 # (b_t, C, hw_t)
    s = s_ref[...].astype(jnp.float32)                 # (b_t, C, 1)
    xca = x * s
    c = x.shape[1]
    avg_ref[...] = (jnp.sum(xca, axis=1, keepdims=True) * (1.0 / c)).astype(avg_ref.dtype)
    max_ref[...] = jnp.max(xca, axis=1, keepdims=True).astype(max_ref.dtype)


# ---------------------------------------------------------------------------
# K3: 7x7 conv (2 -> 1 channels, no bias) + sigmoid, per batch
# ---------------------------------------------------------------------------
def _make_sa_conv_kernel(ksize):
    # TODO(synk): at large H/W, tile rows with a (ksize-1)-row halo and realize the dx
    # shifts with pltpu.roll (or an MXU im2col dot) instead of 2*k*k sliced taps.
    def kernel(w_ref, avg_ref, max_ref, sa_ref):
        h_out = sa_ref.shape[1]
        w_out = sa_ref.shape[2]
        acc = jnp.zeros((h_out, w_out), jnp.float32)
        planes = (avg_ref[0], max_ref[0])              # each (Hp, Wp)
        for ci in range(2):
            plane = planes[ci]
            for dy in range(ksize):
                rows = plane[dy:dy + h_out, :]         # hoisted row slice
                for dx in range(ksize):
                    wgt = w_ref[ci * ksize * ksize + dy * ksize + dx]
                    acc = acc + wgt * rows[:, dx:dx + w_out]
        sa_ref[...] = (1.0 / (1.0 + jnp.exp(-acc)))[None, :, :]

    return kernel


# ---------------------------------------------------------------------------
# K4: out = sa * (scale * x)   (recompute x_ca from x + scale)
# ---------------------------------------------------------------------------
def _apply_kernel(x_ref, s_ref, sa_ref, o_ref):
    x = x_ref[...].astype(jnp.float32)                 # (b_t, C, hw_t)
    s = s_ref[...].astype(jnp.float32)                 # (b_t, C, 1)
    sa = sa_ref[...].astype(jnp.float32)               # (b_t, 1, hw_t)
    o_ref[...] = (x * s * sa).astype(o_ref.dtype)


# ---------------------------------------------------------------------------
# Wrapper
# ---------------------------------------------------------------------------
def mixed_attention(x, w1, w2, conv_w, *, hw_tile=None):
    """x: (B, C, H, W). w1: (C//r, C), w2: (C, C//r) (PyTorch Linear layout).
    conv_w: (1, 2, k, k) (PyTorch Conv2d layout, no bias)."""
    b, c, h, w = x.shape
    cr = w1.shape[0]
    ksize = conv_w.shape[-1]
    pad = ksize // 2
    hw = h * w
    dtype = x.dtype
    itemsize = x.dtype.itemsize

    b_tile, hw_tile = _select_tiles(b, c, hw, itemsize, hw_tile)
    n_b = b // b_tile
    hw_pad = _round_up(hw, hw_tile)
    n_hw = hw_pad // hw_tile
    masked = hw_pad != hw

    x_flat = x.reshape(b, c, hw)
    if masked:
        x_flat = jnp.pad(x_flat, ((0, 0), (0, 0), (0, hw_pad - hw)))

    # --- K1: channel-attention scale (B, C, 1) ------------------------------
    k1_bytes = (2 * b_tile * c * hw_tile * itemsize      # x double-buffered
                + 4 * cr * c * 4 + 4 * b_tile * c * 4    # weights + out
                + 2 * b_tile * c * 4)                    # scratch accumulators
    ca_scale = pl.pallas_call(
        _make_ca_scale_kernel(hw, masked),
        out_shape=jax.ShapeDtypeStruct((b, c, 1), jnp.float32),
        grid=(n_b, n_hw),
        in_specs=[
            pl.BlockSpec((b_tile, c, hw_tile), lambda i, k: (i, 0, k)),
            pl.BlockSpec((cr, c), lambda i, k: (0, 0)),   # weights resident across HW steps
            pl.BlockSpec((c, cr), lambda i, k: (0, 0)),
        ],
        out_specs=pl.BlockSpec((b_tile, c, 1), lambda i, k: (i, 0, 0)),
        scratch_shapes=[
            pltpu.VMEM((b_tile, c), jnp.float32),          # running sum
            pltpu.VMEM((b_tile, c), jnp.float32),          # running max
        ],
        compiler_params=pltpu.CompilerParams(
            dimension_semantics=("parallel", "arbitrary"),
            vmem_limit_bytes=_vmem_limit(k1_bytes)),
        cost_estimate=pl.CostEstimate(
            flops=int(2 * b * c * hw_pad + 4 * (2 * b) * c * cr),
            transcendentals=int(b * c),
            bytes_accessed=int(b * c * hw_pad * itemsize + b * c * 4)),
    )(x_flat, w1, w2)

    # --- K2: mean/max over channels of scale*x (two lane-dense planes) ------
    k2_bytes = (2 * b_tile * c * hw_tile * itemsize + 2 * b_tile * c * 4
                + 4 * b_tile * hw_tile * 4)
    avg_flat, max_flat = pl.pallas_call(
        _pool_ca_kernel,
        out_shape=(jax.ShapeDtypeStruct((b, 1, hw_pad), jnp.float32),
                   jax.ShapeDtypeStruct((b, 1, hw_pad), jnp.float32)),
        grid=(n_b, n_hw),
        in_specs=[
            pl.BlockSpec((b_tile, c, hw_tile), lambda i, k: (i, 0, k)),
            pl.BlockSpec((b_tile, c, 1), lambda i, k: (i, 0, 0)),
        ],
        out_specs=(
            pl.BlockSpec((b_tile, 1, hw_tile), lambda i, k: (i, 0, k)),
            pl.BlockSpec((b_tile, 1, hw_tile), lambda i, k: (i, 0, k)),
        ),
        compiler_params=pltpu.CompilerParams(
            dimension_semantics=("parallel", "parallel"),
            vmem_limit_bytes=_vmem_limit(k2_bytes)),
        cost_estimate=pl.CostEstimate(
            flops=int(3 * b * c * hw_pad),
            transcendentals=0,
            bytes_accessed=int(b * c * hw_pad * itemsize + 2 * b * hw_pad * 4)),
    )(x_flat, ca_scale)

    # --- K3: spatial conv + sigmoid (tiny, per batch) ------------------------
    def _to_plane(p):
        p = p[:, 0, :hw] if masked else p[:, 0, :]
        p = p.reshape(b, h, w)
        return jnp.pad(p, ((0, 0), (pad, pad), (pad, pad)))

    avg_padded = _to_plane(avg_flat)                       # (b, Hp, Wp) f32
    max_padded = _to_plane(max_flat)
    w_flat = conv_w.reshape(-1).astype(jnp.float32)        # (2*k*k,)
    hp, wp = h + 2 * pad, w + 2 * pad
    k3_bytes = 4 * hp * wp * 4 + 2 * h * w * 4

    sa = pl.pallas_call(
        _make_sa_conv_kernel(ksize),
        out_shape=jax.ShapeDtypeStruct((b, h, w), jnp.float32),
        grid=(b,),
        in_specs=[
            pl.BlockSpec(memory_space=pltpu.MemorySpace.SMEM),
            pl.BlockSpec((1, hp, wp), lambda i: (i, 0, 0)),
            pl.BlockSpec((1, hp, wp), lambda i: (i, 0, 0)),
        ],
        out_specs=pl.BlockSpec((1, h, w), lambda i: (i, 0, 0)),
        compiler_params=pltpu.CompilerParams(
            dimension_semantics=("parallel",),
            vmem_limit_bytes=_vmem_limit(k3_bytes)),
    )(w_flat, avg_padded, max_padded)

    sa_flat = sa.reshape(b, 1, hw)
    if masked:
        sa_flat = jnp.pad(sa_flat, ((0, 0), (0, 0), (0, hw_pad - hw)))

    # --- K4: out = sa * (scale * x) ------------------------------------------
    k4_bytes = (4 * b_tile * c * hw_tile * itemsize + 2 * b_tile * c * 4
                + 2 * b_tile * hw_tile * 4)
    out_flat = pl.pallas_call(
        _apply_kernel,
        out_shape=jax.ShapeDtypeStruct((b, c, hw_pad), dtype),
        grid=(n_b, n_hw),
        in_specs=[
            pl.BlockSpec((b_tile, c, hw_tile), lambda i, k: (i, 0, k)),
            pl.BlockSpec((b_tile, c, 1), lambda i, k: (i, 0, 0)),
            pl.BlockSpec((b_tile, 1, hw_tile), lambda i, k: (i, 0, k)),
        ],
        out_specs=pl.BlockSpec((b_tile, c, hw_tile), lambda i, k: (i, 0, k)),
        compiler_params=pltpu.CompilerParams(
            dimension_semantics=("parallel", "parallel"),
            vmem_limit_bytes=_vmem_limit(k4_bytes)),
        cost_estimate=pl.CostEstimate(
            flops=int(2 * b * c * hw_pad),
            transcendentals=0,
            bytes_accessed=int(2 * b * c * hw_pad * itemsize + b * hw_pad * 4)),
    )(x_flat, ca_scale, sa_flat)

    out = out_flat[:, :, :hw] if masked else out_flat
    return out.reshape(b, c, h, w)


# ---------------------------------------------------------------------------
# Pure-JAX reference matching the PyTorch MixedAttention forward
# ---------------------------------------------------------------------------
def _ref_mixed_attention(x, w1, w2, conv_w):
    b, c, _, _ = x.shape
    avg = jnp.mean(x, axis=(2, 3))
    mx = jnp.max(x, axis=(2, 3))

    def fc(v):
        return jnp.maximum(v @ w1.T, 0.0) @ w2.T

    ca = jax.nn.sigmoid(fc(avg) + fc(mx)).reshape(b, c, 1, 1)
    x_ca = ca * x

    avg_c = jnp.mean(x_ca, axis=1, keepdims=True)
    max_c = jnp.max(x_ca, axis=1, keepdims=True)
    concat = jnp.concatenate([avg_c, max_c], axis=1)        # (b, 2, h, w)
    pad = conv_w.shape[-1] // 2
    sa = lax.conv_general_dilated(
        concat, conv_w, window_strides=(1, 1),
        padding=((pad, pad), (pad, pad)),
        dimension_numbers=("NCHW", "OIHW", "NCHW"))
    sa = jax.nn.sigmoid(sa)                                 # (b, 1, h, w)
    return sa * x_ca


if __name__ == "__main__":
    key = jax.random.PRNGKey(0)
    k_x, k_w1, k_w2, k_cw = jax.random.split(key, 4)

    B, C, H, W = 2, 32, 16, 16
    reduction = 16
    Cr = C // reduction          # 2
    KSIZE = 7

    x = jax.random.normal(k_x, (B, C, H, W), dtype=jnp.float32)
    # PyTorch layouts: Linear (out, in), Conv2d (out, in, kh, kw), all bias-free.
    w1 = jax.random.normal(k_w1, (Cr, C), dtype=jnp.float32) * 0.1
    w2 = jax.random.normal(k_w2, (C, Cr), dtype=jnp.float32) * 0.1
    conv_w = jax.random.normal(k_cw, (1, 2, KSIZE, KSIZE), dtype=jnp.float32) * 0.1

    # hw_tile=128 -> 2 HW steps (exercises the tiled accumulator path) and b_tile=1
    # (exercises the batch-split layouts).
    out = mixed_attention(x, w1, w2, conv_w, hw_tile=128)
    out = jax.block_until_ready(out)
    ref = _ref_mixed_attention(x, w1, w2, conv_w)
    assert out.shape == (B, C, H, W), out.shape
    assert jnp.allclose(out, ref, atol=1e-5, rtol=1e-5), float(
        jnp.max(jnp.abs(out - ref)))

    # Non-multiple-of-128 spatial size -> exercises the masked last-tile max path.
    H2 = W2 = 15
    x2 = jax.random.normal(k_x, (B, C, H2, W2), dtype=jnp.float32)
    out2 = mixed_attention(x2, w1, w2, conv_w, hw_tile=128)
    out2 = jax.block_until_ready(out2)
    ref2 = _ref_mixed_attention(x2, w1, w2, conv_w)
    assert jnp.allclose(out2, ref2, atol=1e-5, rtol=1e-5), float(
        jnp.max(jnp.abs(out2 - ref2)))

    print("KERNEL_OK")
</pallas_src>

<mosaic_0001>
module attributes {stable_mosaic.version = 11 : i64} {
  func.func @kernel(%arg0: i32, %arg1: i32, %arg2: memref<1x32x128xf32, #tpu.memory_space<vmem>>, %arg3: memref<2x32xf32, #tpu.memory_space<vmem>>, %arg4: memref<32x2xf32, #tpu.memory_space<vmem>>, %arg5: memref<1x32x1xf32, #tpu.memory_space<vmem>>, %arg6: memref<1x32xf32, #tpu.memory_space<vmem>>, %arg7: memref<1x32xf32, #tpu.memory_space<vmem>>) attributes {dimension_semantics = [#tpu.dimension_semantics<parallel>, #tpu.dimension_semantics<arbitrary>], iteration_bounds = array<i64: 2, 2>, scalar_prefetch = 0 : i64, scratch_operands = 2 : i64, tpu.core_type = #tpu.core_type<tc>, window_params = [{transform_indices = @transform_0, window_bounds = array<i64: 1, 32, 128>}, {pipeline_mode = #tpu.pipeline_mode<synchronous>, transform_indices = @transform_1, window_bounds = array<i64: 2, 32>}, {pipeline_mode = #tpu.pipeline_mode<synchronous>, transform_indices = @transform_2, window_bounds = array<i64: 32, 2>}, {transform_indices = @transform_3, window_bounds = array<i64: 1, 32, 1>}]} {
    %c0 = arith.constant 0 : index
    %c0_0 = arith.constant 0 : index
    %c0_1 = arith.constant 0 : index
    %0 = vector.load %arg2[%c0, %c0_0, %c0_1] : memref<1x32x128xf32, #tpu.memory_space<vmem>>, vector<1x32x128xf32>
    %c0_i32 = arith.constant 0 : i32
    %1 = arith.cmpi eq, %arg1, %c0_i32 : i32
    %2 = arith.extui %1 : i1 to i32
    %c0_i32_2 = arith.constant 0 : i32
    %3 = arith.cmpi ne, %2, %c0_i32_2 : i32
    scf.if %3 {
      %cst_13 = arith.constant 0.000000e+00 : f32
      %15 = vector.broadcast %cst_13 : f32 to vector<1x32xf32>
      %c0_14 = arith.constant 0 : index
      %c0_15 = arith.constant 0 : index
      %16 = vector.load %arg6[%c0_14, %c0_15] : memref<1x32xf32, #tpu.memory_space<vmem>>, vector<1x32xf32>
      tpu.vector_store %arg6[%c0_14, %c0_15], %15 {strides = array<i32>} : memref<1x32xf32, #tpu.memory_space<vmem>>, vector<1x32xf32>,
      %cst_16 = arith.constant 0xFF800000 : f32
      %17 = vector.broadcast %cst_16 : f32 to vector<1x32xf32>
      %c0_17 = arith.constant 0 : index
      %c0_18 = arith.constant 0 : index
      %18 = vector.load %arg7[%c0_17, %c0_18] : memref<1x32xf32, #tpu.memory_space<vmem>>, vector<1x32xf32>
      tpu.vector_store %arg7[%c0_17, %c0_18], %17 {strides = array<i32>} : memref<1x32xf32, #tpu.memory_space<vmem>>, vector<1x32xf32>,
    } else {
    }
    %c0_3 = arith.constant 0 : index
    %c0_4 = arith.constant 0 : index
    %4 = vector.load %arg6[%c0_3, %c0_4] : memref<1x32xf32, #tpu.memory_space<vmem>>, vector<1x32xf32>
    %cst = arith.constant dense<0.000000e+00> : vector<1x32xf32>
    %5 = vector.multi_reduction <add>, %0, %cst [2] : vector<1x32x128xf32> to vector<1x32xf32>
    %6 = arith.addf %4, %5 : vector<1x32xf32>
    %c0_5 = arith.constant 0 : index
    %c0_6 = arith.constant 0 : index
    %7 = vector.load %arg6[%c0_5, %c0_6] : memref<1x32xf32, #tpu.memory_space<vmem>>, vector<1x32xf32>
    tpu.vector_store %arg6[%c0_5, %c0_6], %6 {strides = array<i32>} : memref<1x32xf32, #tpu.memory_space<vmem>>, vector<1x32xf32>,
    %c0_7 = arith.constant 0 : index
    %c0_8 = arith.constant 0 : index
    %8 = vector.load %arg7[%c0_7, %c0_8] : memref<1x32xf32, #tpu.memory_space<vmem>>, vector<1x32xf32>
    %cst_9 = arith.constant dense<0xFF800000> : vector<1x32xf32>
    %9 = vector.multi_reduction <maximumf>, %0, %cst_9 [2] : vector<1x32x128xf32> to vector<1x32xf32>
    %10 = arith.maximumf %8, %9 : vector<1x32xf32>
    %c0_10 = arith.constant 0 : index
    %c0_11 = arith.constant 0 : index
    %11 = vector.load %arg7[%c0_10, %c0_11] : memref<1x32xf32, #tpu.memory_space<vmem>>, vector<1x32xf32>
    tpu.vector_store %arg7[%c0_10, %c0_11], %10 {strides = array<i32>} : memref<1x32xf32, #tpu.memory_space<vmem>>, vector<1x32xf32>,
    %c1_i32 = arith.constant 1 : i32
    %12 = arith.cmpi eq, %arg1, %c1_i32 : i32
    %13 = arith.extui %12 : i1 to i32
    %c0_i32_12 = arith.constant 0 : i32
    %14 = arith.cmpi ne, %13, %c0_i32_12 : i32
    scf.if %14 {
      %c0_13 = arith.constant 0 : index
      %c0_14 = arith.constant 0 : index
      %15 = vector.load %arg7[%c0_13, %c0_14] : memref<1x32xf32, #tpu.memory_space<vmem>>, vector<1x32xf32>
      %c0_15 = arith.constant 0 : index
      %c0_16 = arith.constant 0 : index
      %16 = vector.load %arg6[%c0_15, %c0_16] : memref<1x32xf32, #tpu.memory_space<vmem>>, vector<1x32xf32>
      %cst_17 = arith.constant 3.906250e-03 : f32
      %17 = vector.broadcast %cst_17 : f32 to vector<1x32xf32>
      %18 = arith.mulf %16, %17 : vector<1x32xf32>
      %19 = tpu.concatenate %18, %15 in 0 : vector<1x32xf32>, vector<1x32xf32> -> vector<2x32xf32>
      %c0_18 = arith.constant 0 : index
      %c0_19 = arith.constant 0 : index
      %20 = vector.load %arg3[%c0_18, %c0_19] : memref<2x32xf32, #tpu.memory_space<vmem>>, vector<2x32xf32>
      %c0_20 = arith.constant 0 : index
      %c0_21 = arith.constant 0 : index
      %21 = vector.load %arg4[%c0_20, %c0_21] : memref<32x2xf32, #tpu.memory_space<vmem>>, vector<32x2xf32>
      %cst_22 = arith.constant dense<0.000000e+00> : vector<2x2xf32>
      %22 = tpu.matmul %19, %20, %cst_22 {dimension_numbers = #tpu.dot_dimension_numbers<[1], [1], [0], [0], [0, 0, 1, 0], [], []>} : vector<2x32xf32>, vector<2x32xf32>, vector<2x2xf32> -> vector<2x2xf32>
      %cst_23 = arith.constant 0.000000e+00 : f32
      %23 = vector.broadcast %cst_23 : f32 to vector<2x2xf32>
      %24 = arith.maximumf %22, %23 : vector<2x2xf32>
      %cst_24 = arith.constant dense<0.000000e+00> : vector<2x32xf32>
      %25 = tpu.matmul %24, %21, %cst_24 {dimension_numbers = #tpu.dot_dimension_numbers<[1], [1], [0], [0], [0, 0, 1, 0], [], []>} : vector<2x2xf32>, vector<32x2xf32>, vector<2x32xf32> -> vector<2x32xf32>
      %26 = vector.extract_strided_slice %25 {offsets = [0, 0], sizes = [1, 32], strides = [1, 1]} : vector<2x32xf32> to vector<1x32xf32>
      %27 = vector.extract_strided_slice %25 {offsets = [1, 0], sizes = [1, 32], strides = [1, 1]} : vector<2x32xf32> to vector<1x32xf32>
      %28 = arith.addf %26, %27 : vector<1x32xf32>
      %cst_25 = arith.constant 0.000000e+00 : f32
      %29 = vector.broadcast %cst_25 : f32 to vector<1x32xf32>
      %30 = arith.subf %29, %28 : vector<1x32xf32>
      %31 = math.exp %30 : vector<1x32xf32>
      %cst_26 = arith.constant 1.000000e+00 : f32
      %32 = vector.broadcast %cst_26 : f32 to vector<1x32xf32>
      %33 = arith.addf %32, %31 : vector<1x32xf32>
      %cst_27 = arith.constant 1.000000e+00 : f32
      %34 = vector.broadcast %cst_27 : f32 to vector<1x32xf32>
      %35 = arith.divf %34, %33 : vector<1x32xf32>
      %36 = vector.shape_cast %35 : vector<1x32xf32> to vector<1x32x1xf32>
      %c0_28 = arith.constant 0 : index
      %c0_29 = arith.constant 0 : index
      %c0_30 = arith.constant 0 : index
      %37 = vector.load %arg5[%c0_28, %c0_29, %c0_30] : memref<1x32x1xf32, #tpu.memory_space<vmem>>, vector<1x32x1xf32>
      tpu.vector_store %arg5[%c0_28, %c0_29, %c0_30], %36 {strides = array<i32>} : memref<1x32x1xf32, #tpu.memory_space<vmem>>, vector<1x32x1xf32>,
    } else {
    }
    return
  }
  func.func @transform_0(%arg0: i32, %arg1: i32) -> (i32, i32, i32) {
    %c0_i32 = arith.constant 0 : i32
    %c0_i32_0 = arith.constant 0 : i32
    return %arg0, %c0_i32, %arg1 : i32, i32, i32
  }
  func.func @transform_1(%arg0: i32, %arg1: i32) -> (i32, i32) {
    %c0_i32 = arith.constant 0 : i32
    %c0_i32_0 = arith.constant 0 : i32
    %c0_i32_1 = arith.constant 0 : i32
    return %c0_i32, %c0_i32_0 : i32, i32
  }
  func.func @transform_2(%arg0: i32, %arg1: i32) -> (i32, i32) {
    %c0_i32 = arith.constant 0 : i32
    %c0_i32_0 = arith.constant 0 : i32
    %c0_i32_1 = arith.constant 0 : i32
    return %c0_i32, %c0_i32_0 : i32, i32
  }
  func.func @transform_3(%arg0: i32, %arg1: i32) -> (i32, i32, i32) {
    %c0_i32 = arith.constant 0 : i32
    %c0_i32_0 = arith.constant 0 : i32
    %c0_i32_1 = arith.constant 0 : i32
    return %arg0, %c0_i32, %c0_i32_0 : i32, i32, i32
  }
}

</mosaic_0001>

<bundles_post_ra>
// kernel: tpu_custom_call.1
= control target key start
LH: loop header
LB: loop body
LE: loop exit
PB: predicated region body
PF: predicated region fallthrough
CT: control target
= control target key end

     0   :  { %8 = vsyncpa [#allocation5], 0  ;;  %s1864_s0 = inlined_call_operand.hbm [shape: f32[2,32,256], index: 0, kind: input, shape index: {}]   ;;  %s1865_s1 = inlined_call_operand.vmem [shape: f32[2,32], index: 1, kind: input, shape index: {}]   ;;  %s1866_s2 = inlined_call_operand.vmem [shape: f32[32,2], index: 2, kind: input, shape index: {}]   ;;  %s1867_s3 = inlined_call_operand.vmem [shape: f32[2,32,1], index: 3, kind: output, shape index: {}]  }
   0x1   :  { %10 = vsyncpa [#allocation5 + $0x1], 0  ;;  %s1553_s12 = smov 0   ;;  %s1555_s13 = smov 0  }
   0x2   :  { %s1557_s14 = smov 0   ;;  %s1559_s15 = smov 0  }
   0x3   :  { %s1561_s16 = smov 0   ;;  %s1563_s17 = smov 0  }
   0x4   :  { %s1565_s18 = smov 0   ;;  %s1567_s19 = smov 0  }
   0x5 LB: > { %s1294_s20 = sadd.s32 4294967295, %s1521_s19   ;;  %s25_s21 = sadd.s32 1, %s1513_s17  ;;  %s1521_s19 = sphi %s1567_s19, %s16_s19   ;;  %s1517_s18 = sphi %s1565_s18, %s1877_s18   ;;  %s1513_s17 = sphi %s1563_s17, %s1876_s17   ;;  %s1509_s16 = sphi %s1561_s16, %s1875_s16   ;;  %s1505_s15 = sphi %s1559_s15, %s1874_s15   ;;  %s1501_s14 = sphi %s1557_s14, %s1873_s14   ;;  %s1497_s13 = sphi %s1555_s13, %s1872_s13   ;;  %s1493_s12 = sphi %s1553_s12, %s1871_s12  }
   0x6   : > { %p26_p0 = scmp.ge.s32.totalorder %s25_s21, 2  ;;  %s28_s22 = sadd.s32 1, %s1517_s18 }
   0x7   : > { %s37_s23 = sadd.s32 1, %s1501_s14  ;;  %p44_p1 = scmp.ne.s32.totalorder %s1501_s14, %s1497_s13 }
   0x8   : > { %s1879_s21 = smov (%p26_p0, %s25_s21), 0  ;;  %s1881_s22 = smov (!%p26_p0, %s28_s22), %s1517_s18 }
   0x9   : > { %s33_s24 = ssub.s32 %s1513_s17, %s1879_s21  ;;  %p45_p2 = scmp.eq.s32.totalorder %s1521_s19, 0 }
   0xa   : > { %p30_p3 = scmp.ge.s32.totalorder %s1881_s22, 2  ;;  %p50_p4 = scmp.ne.s32.totalorder %s1497_s13, %s1493_s12 }
   0xb   : > { %p1604_p5 = por %p45_p2, %p44_p1  ;;  %p51_p6 = scmp.eq.s32.totalorder %s1294_s20, 0 }
   0xc   : > { %s1883_s22 = smov (%p30_p3, %s1881_s22), 0  ;;  %p1347_p8 = scmp.lt.s32.totalorder %s1521_s19, 4 }
   0xd   : > { %p1610_p7 = por %p51_p6, %p50_p4  ;;  %s32_s27 = ssub.s32 %s1517_s18, %s1883_s22 }
   0xe   : > { %s34_s28 = sor.u32 %s33_s24, %s32_s27  ;;  %s148_s29 = sand.u32 1, %s1501_s14  }
   0xf   : > { %p35_p9 = scmp.eq.s32.totalorder %s34_s28, 0  ;;  %s1298_s30 = sshll.u32 %s148_s29, 5 }
  0x10   : > { %s1299_s4 = sshll.u32 %s1517_s18, 3  ;;  %s152_s8 = scalar_lea.vmem [#allocation4], %s1298_s30 }
  0x11   : > { %s1620_s5 = scalar_select %p35_p9, %s1501_s14, %s37_s23  }
  0x12   : > { %s157_s6 = sadd.s32 %s1513_s17, %s1299_s4  ;;  %s160_s9 = sshll.u32 %s152_s8, 4  ;;  %s161_s9 = int_to_ptr.vmem [resolvable:$true] %s160_s9 }
  0x13   : > { %s1300_s7 = sshll.u32 %s157_s6, 7  ;;  %p1630_p10 = pnand %p1347_p8, %p1604_p5 }
  0x14   : > { %s159_s12 = scalar_lea.hbm %s1864_s0, %s1300_s7  ;;  %p1301_p11 = scmp.ge.s32.totalorder %s1521_s19, 1 }
  0x15   : > { %s149_s24 = scalar_lea.sflag [#allocation5], %s148_s29  ;;  %p1429_p12 = pneg %p1630_p10 }
  0x16   : > { %s1440_s23 = scalar_lea.vmem %s161_s9, 512  ;;  %s1523_s27 = smov [#allocation4]  }
  0x17   : > { %p1441_p13 = scmp.ne.s32.totalorder %s161_s9, %s1440_s23  ;;  %s1445_s28 = sshll.u32 %s1523_s27, 4  ;;  %s1446_s28 = int_to_ptr.vmem [resolvable:$false] %s1445_s28 }
  0x18   : > { %s1447_s30 = scalar_lea.vmem %s1446_s28, 1024  ;;  %p1448_p2 = scmp.lt.s32.totalorder %s161_s9, %s1446_s28 }
  0x19   : > { %p1443_p0 = pnand %p1441_p13, %p1429_p12  ;;  %p1449_p3 = scmp.lt.s32.totalorder %s1447_s30, %s1440_s23 }
  0x1b   : > { %p1444_p1 = pneg %p1443_p0  ;;  %p1450_p4 = por %p1449_p3, %p1448_p2 }
  0x1d   : > { %p1451_p5 = pnand %p1450_p4, %p1444_p1 }
  0x1f   : > { %1454 = shalt.err (!%p1451_p5)
}
  0x20   : > { %s1524_s25 = smov 256   ;;  %s1525_s29 = smov 128  }
  0x21   : > { %s1526_s4 = smov 8   ;;  %p168_p6 = scmp.lt.s32.totalorder %s1521_s19, 5 }
  0x22   : > { %1346 = dma.hbm_to_vmem [thread:$0]  (!%p1630_p10), %s159_s12, 512, %s161_s9, %s149_s24, %s1524_s25, %s1525_s29, %s1526_s4  }
  0x23   : > { %p169_p8 = pnand %p1301_p11, %p168_p6 }
  0x24   : > { %s174_s6 = sand.u32 (!%p169_p8), 1, %s1497_s13  }
  0x25   : > { %172 = sbr.rel (%p169_p8) target bundleno = 929 (0x3a1), region = 32  ;;  %s1302_s7 = sshll.u32 (!%p169_p8), %s174_s6, 5 }
  0x26   : > { %s175_s8 = scalar_lea.sflag (!%p169_p8), [#allocation5], %s174_s6  ;;  %s178_s10 = scalar_lea.vmem (!%p169_p8), [#allocation4], %s1302_s7 }
  0x2a   : > { %1488 = dma.done.wait (%p1610_p7), %s175_s8, 512  }
  0x2b   : > { %1490 = vsyncadd (%p1610_p7), %s175_s8, 4294966784  ;;  %p201_p9 = scmp.lt.s32.totalorder %s1509_s16, 1  ;;  %v206_v0 = vld [vmem:[%s178_s10] sm:$0xff]  ;;  %v207_v1 = vld [vmem:[%s178_s10 + $0x8] sm:$0xff]  ;;  %p1305_p10 = scmp.ne.s32.totalorder %s1505_s15, 0 }
  0x2c   : > { %v208_v2 = vld [vmem:[%s178_s10 + $0x10] sm:$0xff]  ;;  %v209_v3 = vld [vmem:[%s178_s10 + $0x18] sm:$0xff] }
  0x2d   : > { %s1885_s16 = smov (!%p201_p9, %s1509_s16), 1  ;;  %213 = sbr.rel (%p1305_p10) target bundleno = 52 (0x34), region = 40 }
  0x2e   : > { %s1317_s9 = sshll.u32 %s1885_s16, 5 }
  0x2f   : > { %s1652_s20 = scalar_lea.vmem %s1867_s3, %s1317_s9 }
  0x32   : > { %vm214_vm0 = vcmask 253952   ;;  %v1527_v4 = vmov 0.0   ;;  %v1528_v5 = vmov -inf  }
  0x33   : > { %215 = vst.msk [vmem:[#allocation2] sm:$0x1] %vm214_vm0, %v1527_v4  ;;  %216 = vst.msk [vmem:[#allocation3] sm:$0x1] %vm214_vm0, %v1528_v5 }
  0x34 PF: > { %218 = vadd.xlane.f32.xlu0 %v206_v0  ;;  %612 = vmax.xlane.f32.xlu1 %v206_v0  ;;  %v1529_v6 = vmov 0   ;;  %v230_v7 = vlaneseq  ;;  %v1530_v8 = vmov 1966171168   ;;  %vm577_vm1 = vcmask 130112   ;;  %p1306_p7 = scmp.ne.s32.totalorder %s1505_s15, 1 }
  0x35   : > { %1421 = vset.pattern.permute.xlu0 %v1529_v6  ;;  %1422 = vset.pattern.permute.xlu1 %v1529_v6  ;;  %v363_v9 = vunpack.c.l.s4 %v1530_v8  ;;  %vm584_vm2 = vcmask 195712   ;;  %vm591_vm3 = vcmask 261312   ;;  %vm609_vm4 = vcmask 253952  }
  0x36   : > { %v1656_v10 = vshrl.u32 %v230_v7, 7 }
  0x37   : > { %v364_v11 = vunpack.c.0.s8 %v363_v9 }
  0x38   : > { %220 = vadd.xlane.f32.xlu0 %v207_v1  ;;  %614 = vmax.xlane.f32.xlu1 %v207_v1  ;;  %v1659_v12 = vsub.s32 0, %v1656_v10  ;;  %v1662_v13 = vsub.s32 1, %v1656_v10  ;;  %v1665_v14 = vsub.s32 2, %v1656_v10  ;;  %v1668_v15 = vsub.s32 3, %v1656_v10 }
  0x39   : > { %v1671_v16 = vsub.s32 4, %v1656_v10  ;;  %v1674_v17 = vsub.s32 5, %v1656_v10  ;;  %v1677_v18 = vsub.s32 6, %v1656_v10  ;;  %v1680_v19 = vsub.s32 7, %v1656_v10 }
  0x3a   : > { %v1683_v22 = vsub.s32 %v364_v11, %v1656_v10 }
  0x3c   : > { %222 = vadd.xlane.f32.xlu0 %v208_v2  ;;  %616 = vmax.xlane.f32.xlu1 %v208_v2 }
  0x40   : > { %224 = vadd.xlane.f32.xlu0 %v209_v3  ;;  %618 = vmax.xlane.f32.xlu1 %v209_v3 }
  0xbd   : > { %v219_v20 = vpop.xlane.xlu0 %218  ;;  %v613_v21 = vpop.xlane.xlu1 %612 }
  0xbe   : > { %v233_v23 = vrot.slane %v219_v20, %v1659_v12  ;;  %v237_v24 = vrot.slane %v219_v20, %v1662_v13  ;;  %v241_v25 = vrot.slane %v219_v20, %v1665_v14  ;;  %v245_v26 = vrot.slane %v219_v20, %v1668_v15 }
  0xbf   : > { %v249_v27 = vrot.slane %v219_v20, %v1671_v16  ;;  %v253_v28 = vrot.slane %v219_v20, %v1674_v17  ;;  %v257_v29 = vrot.slane %v219_v20, %v1677_v18  ;;  %v261_v30 = vrot.slane %v219_v20, %v1680_v19 }
  0xc0   : > { %v358_v31 = vcombine.low %v233_v23, %v237_v24  ;;  %v359_v32 = vcombine.low %v241_v25, %v245_v26  ;;  %v627_v33 = vrot.slane %v613_v21, %v1659_v12  ;;  %v631_v34 = vrot.slane %v613_v21, %v1662_v13 }
  0xc1   : > { %v221_v35 = vpop.xlane.xlu0 %220  ;;  %v360_v36 = vcombine.low %v249_v27, %v253_v28  ;;  %v361_v37 = vcombine.low %v257_v29, %v261_v30  ;;  %v635_v38 = vrot.slane %v613_v21, %v1665_v14  ;;  %v639_v39 = vrot.slane %v613_v21, %v1668_v15  ;;  %v615_v60 = vpop.xlane.xlu1 %614 }
  0xc2   : > { %v368_v40 = vrot.slane %v358_v31, %v1683_v22  ;;  %v375_v41 = vrot.slane %v359_v32, %v1683_v22  ;;  %v265_v42 = vrot.slane %v221_v35, %v1659_v12  ;;  %v269_v43 = vrot.slane %v221_v35, %v1662_v13 }
  0xc3   : > { %v382_v44 = vrot.slane %v360_v36, %v1683_v22  ;;  %v389_v45 = vrot.slane %v361_v37, %v1683_v22  ;;  %v273_v46 = vrot.slane %v221_v35, %v1665_v14  ;;  %v277_v47 = vrot.slane %v221_v35, %v1668_v15 }
  0xc4   : > { %v390_v48 = vcombine.low %v368_v40, %v375_v41  ;;  %v281_v49 = vrot.slane %v221_v35, %v1671_v16  ;;  %v285_v50 = vrot.slane %v221_v35, %v1674_v17  ;;  %v289_v51 = vrot.slane %v221_v35, %v1677_v18 }
  0xc5   : > { %v391_v52 = vcombine.low %v382_v44, %v389_v45  ;;  %v293_v53 = vrot.slane %v221_v35, %v1680_v19  ;;  %v407_v54 = vcombine.low %v265_v42, %v269_v43  ;;  %v408_v55 = vcombine.low %v273_v46, %v277_v47  ;;  %v223_v32 = vpop.xlane.xlu0 %222 }
  0xc6   : > { %v398_v56 = vrot.slane %v390_v48, %v1683_v22  ;;  %v409_v57 = vcombine.low %v281_v49, %v285_v50  ;;  %v643_v58 = vrot.slane %v613_v21, %v1671_v16  ;;  %v647_v59 = vrot.slane %v613_v21, %v1674_v17  ;;  %v617_v49 = vpop.xlane.xlu1 %616 }
  0xc7   : > { %v405_v61 = vrot.slane %v391_v52, %v1683_v22  ;;  %v410_v62 = vcombine.low %v289_v51, %v293_v53  ;;  %v417_v63 = vrot.slane %v407_v54, %v1683_v22  ;;  %v424_v0 = vrot.slane %v408_v55, %v1683_v22 }
  0xc8   : > { %v431_v1 = vrot.slane %v409_v57, %v1683_v22  ;;  %v651_v2 = vrot.slane %v613_v21, %v1677_v18  ;;  %v655_v3 = vrot.slane %v613_v21, %v1680_v19  ;;  %v752_v4 = vcombine.low %v627_v33, %v631_v34 }
  0xc9   : > { %v406_v5 = vcombine.low %v398_v56, %v405_v61  ;;  %v438_v6 = vrot.slane %v410_v62, %v1683_v22  ;;  %v439_v8 = vcombine.low %v417_v63, %v424_v0  ;;  %v753_v9 = vcombine.low %v635_v38, %v639_v39 }
  0xca   : > { %v754_v11 = vcombine.low %v643_v58, %v647_v59  ;;  %v755_v20 = vcombine.low %v651_v2, %v655_v3  ;;  %v762_v23 = vrot.slane %v752_v4, %v1683_v22  ;;  %v659_v24 = vrot.slane %v615_v60, %v1659_v12 }
  0xcb   : > { %555 = vperm.xlu0 %1421, %v406_v5   ;;  %v440_v25 = vcombine.low %v431_v1, %v438_v6  ;;  %v447_v26 = vrot.slane %v439_v8, %v1683_v22  ;;  %v769_v27 = vrot.slane %v753_v9, %v1683_v22  ;;  %v663_v21 = vrot.slane %v615_v60, %v1662_v13 }
  0xcc   : > { %v776_v28 = vrot.slane %v754_v11, %v1683_v22  ;;  %v783_v29 = vrot.slane %v755_v20, %v1683_v22  ;;  %v667_v30 = vrot.slane %v615_v60, %v1665_v14  ;;  %v671_v31 = vrot.slane %v615_v60, %v1668_v15  ;;  %v225_v20 = vpop.xlane.xlu0 %224 }
  0xcd   : > { %v454_v33 = vrot.slane %v440_v25, %v1683_v22  ;;  %v784_v34 = vcombine.low %v762_v23, %v769_v27  ;;  %v675_v35 = vrot.slane %v615_v60, %v1671_v16  ;;  %v679_v36 = vrot.slane %v615_v60, %v1674_v17 }
  0xce   : > { %v785_v37 = vcombine.low %v776_v28, %v783_v29  ;;  %v683_v38 = vrot.slane %v615_v60, %v1677_v18  ;;  %v687_v39 = vrot.slane %v615_v60, %v1680_v19  ;;  %v801_v40 = vcombine.low %v659_v24, %v663_v21 }
  0xcf   : > { %v455_v41 = vcombine.low %v447_v26, %v454_v33  ;;  %v792_v42 = vrot.slane %v784_v34, %v1683_v22  ;;  %v802_v43 = vcombine.low %v667_v30, %v671_v31  ;;  %v803_v44 = vcombine.low %v675_v35, %v679_v36 }
  0xd0   : > { %v799_v45 = vrot.slane %v785_v37, %v1683_v22  ;;  %v804_v46 = vcombine.low %v683_v38, %v687_v39  ;;  %v811_v47 = vrot.slane %v801_v40, %v1683_v22  ;;  %v297_v48 = vrot.slane %v223_v32, %v1659_v12 }
  0xd1   : > { %558 = vperm.xlu1 %1422, %v455_v41   ;;  %v818_v50 = vrot.slane %v802_v43, %v1683_v22  ;;  %v825_v51 = vrot.slane %v803_v44, %v1683_v22  ;;  %v301_v52 = vrot.slane %v223_v32, %v1662_v13  ;;  %v305_v53 = vrot.slane %v223_v32, %v1665_v14 }
  0xd2   : > { %v800_v54 = vcombine.low %v792_v42, %v799_v45  ;;  %v832_v55 = vrot.slane %v804_v46, %v1683_v22  ;;  %v309_v56 = vrot.slane %v223_v32, %v1668_v15  ;;  %v313_v57 = vrot.slane %v223_v32, %v1671_v16  ;;  %v619_v42 = vpop.xlane.xlu1 %618 }
  0xd3   : > { %v833_v58 = vcombine.low %v811_v47, %v818_v50  ;;  %v317_v59 = vrot.slane %v223_v32, %v1674_v17  ;;  %v321_v60 = vrot.slane %v223_v32, %v1677_v18  ;;  %v325_v61 = vrot.slane %v223_v32, %v1680_v19 }
  0xd4   : > { %v834_v62 = vcombine.low %v825_v51, %v832_v55  ;;  %v456_v63 = vcombine.low %v297_v48, %v301_v52  ;;  %v457_v0 = vcombine.low %v305_v53, %v309_v56  ;;  %v691_v1 = vrot.slane %v617_v49, %v1659_v12 }
  0xd5   : > { %949 = vperm.xlu1 %1422, %v800_v54   ;;  %v841_v2 = vrot.slane %v833_v58, %v1683_v22  ;;  %v458_v3 = vcombine.low %v313_v57, %v317_v59  ;;  %v459_v4 = vcombine.low %v321_v60, %v325_v61  ;;  %v695_v5 = vrot.slane %v617_v49, %v1662_v13 }
  0xd6   : > { %v848_v6 = vrot.slane %v834_v62, %v1683_v22  ;;  %v466_v8 = vrot.slane %v456_v63, %v1683_v22  ;;  %v473_v9 = vrot.slane %v457_v0, %v1683_v22  ;;  %v699_v11 = vrot.slane %v617_v49, %v1665_v14 }
  0xd7   : > { %v480_v23 = vrot.slane %v458_v3, %v1683_v22  ;;  %v487_v24 = vrot.slane %v459_v4, %v1683_v22  ;;  %v703_v25 = vrot.slane %v617_v49, %v1668_v15  ;;  %v707_v26 = vrot.slane %v617_v49, %v1671_v16 }
  0xd8   : > { %v849_v27 = vcombine.low %v841_v2, %v848_v6  ;;  %v488_v21 = vcombine.low %v466_v8, %v473_v9  ;;  %v711_v28 = vrot.slane %v617_v49, %v1674_v17  ;;  %v715_v29 = vrot.slane %v617_v49, %v1677_v18 }
  0xd9   : > { %v489_v30 = vcombine.low %v480_v23, %v487_v24  ;;  %v719_v31 = vrot.slane %v617_v49, %v1680_v19  ;;  %v850_v32 = vcombine.low %v691_v1, %v695_v5  ;;  %v851_v33 = vcombine.low %v699_v11, %v703_v25 }
  0xda   : > { %952 = vperm.xlu1 %1422, %v849_v27   ;;  %v496_v34 = vrot.slane %v488_v21, %v1683_v22  ;;  %v852_v35 = vcombine.low %v707_v26, %v711_v28  ;;  %v329_v36 = vrot.slane %v225_v20, %v1659_v12  ;;  %v333_v37 = vrot.slane %v225_v20, %v1662_v13 }
  0xdb   : > { %v503_v38 = vrot.slane %v489_v30, %v1683_v22  ;;  %v853_v39 = vcombine.low %v715_v29, %v719_v31  ;;  %v860_v40 = vrot.slane %v850_v32, %v1683_v22  ;;  %v867_v41 = vrot.slane %v851_v33, %v1683_v22 }
  0xdc   : > { %v874_v43 = vrot.slane %v852_v35, %v1683_v22  ;;  %v337_v44 = vrot.slane %v225_v20, %v1665_v14  ;;  %v341_v45 = vrot.slane %v225_v20, %v1668_v15  ;;  %v345_v46 = vrot.slane %v225_v20, %v1671_v16 }
  0xdd   : > { %v504_v47 = vcombine.low %v496_v34, %v503_v38  ;;  %v881_v48 = vrot.slane %v853_v39, %v1683_v22  ;;  %v882_v49 = vcombine.low %v860_v40, %v867_v41  ;;  %v349_v50 = vrot.slane %v225_v20, %v1674_v17 }
  0xde   : > { %v353_v51 = vrot.slane %v225_v20, %v1677_v18  ;;  %v357_v52 = vrot.slane %v225_v20, %v1680_v19  ;;  %v505_v53 = vcombine.low %v329_v36, %v333_v37  ;;  %v506_v54 = vcombine.low %v337_v44, %v341_v45 }
  0xdf   : > { %561 = vperm.xlu1 %1422, %v504_v47   ;;  %v883_v55 = vcombine.low %v874_v43, %v881_v48  ;;  %v890_v56 = vrot.slane %v882_v49, %v1683_v22  ;;  %v507_v57 = vcombine.low %v345_v46, %v349_v50  ;;  %v723_v58 = vrot.slane %v619_v42, %v1659_v12 }
  0xe0   : > { %v508_v59 = vcombine.low %v353_v51, %v357_v52  ;;  %v515_v60 = vrot.slane %v505_v53, %v1683_v22  ;;  %v522_v61 = vrot.slane %v506_v54, %v1683_v22  ;;  %v727_v62 = vrot.slane %v619_v42, %v1662_v13 }
  0xe1   : > { %v897_v63 = vrot.slane %v883_v55, %v1683_v22  ;;  %v529_v0 = vrot.slane %v507_v57, %v1683_v22  ;;  %v731_v1 = vrot.slane %v619_v42, %v1665_v14  ;;  %v735_v2 = vrot.slane %v619_v42, %v1668_v15 }
  0xe2   : > { %v536_v3 = vrot.slane %v508_v59, %v1683_v22  ;;  %v537_v4 = vcombine.low %v515_v60, %v522_v61  ;;  %v739_v5 = vrot.slane %v619_v42, %v1671_v16  ;;  %v743_v6 = vrot.slane %v619_v42, %v1674_v17 }
  0xe3   : > { %v898_v8 = vcombine.low %v890_v56, %v897_v63  ;;  %v747_v9 = vrot.slane %v619_v42, %v1677_v18  ;;  %v751_v13 = vrot.slane %v619_v42, %v1680_v19  ;;  %v899_v11 = vcombine.low %v723_v58, %v727_v62  ;;  %v217_v56 = vld [vmem:[#allocation2] sm:$0x1] }
  0xe4   : > { %v538_v20 = vcombine.low %v529_v0, %v536_v3  ;;  %v545_v23 = vrot.slane %v537_v4, %v1683_v22  ;;  %v900_v24 = vcombine.low %v731_v1, %v735_v2  ;;  %v901_v14 = vcombine.low %v739_v5, %v743_v6  ;;  %v611_v0 = vld [vmem:[#allocation3] sm:$0x1] }
  0xe5   : > { %955 = vperm.xlu1 %1422, %v898_v8   ;;  %v902_v15 = vcombine.low %v747_v9, %v751_v13  ;;  %v909_v25 = vrot.slane %v899_v11, %v1683_v22  ;;  %v567_v34 = vand.u32 127, %v230_v7 }
  0xe6   : > { %v552_v26 = vrot.slane %v538_v20, %v1683_v22  ;;  %v916_v16 = vrot.slane %v900_v24, %v1683_v22  ;;  %v923_v17 = vrot.slane %v901_v14, %v1683_v22 }
  0xe7   : > { %v930_v18 = vrot.slane %v902_v15, %v1683_v22  ;;  %v572_v35 = vadd.s32 4294967288, %v567_v34  ;;  %v579_v37 = vadd.s32 4294967280, %v567_v34  ;;  %v586_v39 = vadd.s32 4294967272, %v567_v34 }
  0xe8   : > { %v553_v27 = vcombine.low %v545_v23, %v552_v26  ;;  %v931_v19 = vcombine.low %v909_v25, %v916_v16  ;;  %v570_v41 = vsub.s32 %v567_v34, %v1656_v10 }
  0xe9   : > { %v932_v21 = vcombine.low %v923_v17, %v930_v18  ;;  %v575_v38 = vsub.s32 %v572_v35, %v1656_v10  ;;  %v582_v40 = vsub.s32 %v579_v37, %v1656_v10  ;;  %v589_v45 = vsub.s32 %v586_v39, %v1656_v10 }
  0xea   : > { %564 = vperm.xlu1 %1422, %v553_v27   ;;  %v939_v28 = vrot.slane %v931_v19, %v1683_v22 }
  0xeb   : > { %v946_v29 = vrot.slane %v932_v21, %v1683_v22 }
  0xed   : > { %v947_v30 = vcombine.low %v939_v28, %v946_v29 }
  0xef   : > { %958 = vperm.xlu1 %1422, %v947_v30  }
 0x146   : > { %v556_v43 = vpop.permute.xlu0 %555 }
 0x147   : > { %v571_v47 = vrot.slane %v556_v43, %v570_v41 }
 0x14c   : > { %v559_v31 = vpop.permute.xlu1 %558 }
 0x14d   : > { %v576_v44 = vrot.slane %v559_v31, %v575_v38 }
 0x14f   : > { %v578_v48 = vsel %vm577_vm1, %v576_v44, %v571_v47 }
 0x150   : > { %v950_v32 = vpop.permute.xlu1 %949 }
 0x151   : > { %v963_v54 = vrot.slane %v950_v32, %v570_v41 }
 0x155   : > { %v953_v33 = vpop.permute.xlu1 %952 }
 0x156   : > { %v967_v50 = vrot.slane %v953_v33, %v575_v38 }
 0x158   : > { %v968_v57 = vsel %vm577_vm1, %v967_v50, %v963_v54 }
 0x15a   : > { %v562_v36 = vpop.permute.xlu1 %561 }
 0x15b   : > { %v583_v46 = vrot.slane %v562_v36, %v582_v40 }
 0x15d   : > { %v585_v51 = vsel %vm584_vm2, %v583_v46, %v578_v48 }
 0x160   : > { %v956_v42 = vpop.permute.xlu1 %955 }
 0x161   : > { %v972_v52 = vrot.slane %v956_v42, %v582_v40 }
 0x163   : > { %v973_v60 = vsel %vm584_vm2, %v972_v52, %v968_v57 }
 0x165   : > { %v565_v7 = vpop.permute.xlu1 %564 }
 0x166   : > { %v590_v49 = vrot.slane %v565_v7, %v589_v45 }
 0x168   : > { %v592_v53 = vsel %vm591_vm3, %v590_v49, %v585_v51 }
 0x169   : > { %v599_v55 = vrot.slane %v592_v53, %v1683_v22 }
 0x16a   : > { %v959_v10 = vpop.permute.xlu1 %958 }
 0x16b   : > { %v606_v58 = vrot.slane %v599_v55, %v1683_v22  ;;  %v977_v59 = vrot.slane %v959_v10, %v589_v45 }
 0x16d   : > { %v608_v61 = vadd.f32 %v606_v58, %v217_v56  ;;  %v978_v62 = vsel %vm591_vm3, %v977_v59, %v973_v60 }
 0x16e   : > { %v985_v63 = vrot.slane %v978_v62, %v1683_v22 }
 0x16f   : > { %610 = vst.msk [vmem:[#allocation2] sm:$0x1] %vm609_vm4, %v608_v61 }
 0x170   : > { %v992_v1 = vrot.slane %v985_v63, %v1683_v22  ;;  %999 = sbr.rel (%p1306_p7) target bundleno = 929 (0x3a1), region = 44 }
 0x172   : > { %v994_v2 = vmax.f32 %v611_v0, %v992_v1 }
 0x174   : > { %995 = vst.msk [vmem:[#allocation3] sm:$0x1] %vm609_vm4, %v994_v2 }
 0x175   : > { %v1011_v3 = vld [vmem:[%s1865_s1] sm:$0x3]  ;;  %vm1016_vm5 = vcmask 261120   ;;  %vm1009_vm6 = vcmask 1040384   ;;  %v1531_v4 = vmov 0.0   ;;  %vm1532_vm7 = vmmov 0  }
 0x176   : > { %1325 = vmatprep.subr.mxu0 %v1531_v4  ;;  %1327 = vmatprep.mubr.msk.f32.mxu0 %vm1532_vm7, %v1531_v4  ;;  %v1001_v6 = vld [vmem:[#allocation2] sm:$0x1]  ;;  %v1015_v22 = vld [vmem:[%s1866_s2 + $0x18] sm:$0xff]  ;;  %vm1094_vm8 = vcmask 15360   ;;  %v1014_v13 = vld [vmem:[%s1866_s2 + $0x10] sm:$0xff]  ;;  %vm1209_vm9 = vcmask 7168  }
 0x177   : > { %1326 = vmatpush3.xpose.msk.msra.mxu0 %vm1016_vm5, %v1011_v3  ;;  %v1002_v8 = vmul.f32 0.00390625, %v1001_v6  ;;  %1330 = vmatprep.subr.mxu1 %v1531_v4  ;;  %v1013_v11 = vld [vmem:[%s1866_s2 + $0x8] sm:$0xff]  ;;  %v1012_v20 = vld [vmem:[%s1866_s2] sm:$0xff] }
 0x178   : > { %1331 = vmatpush3.xpose.msk.msra.mxu1 %vm1094_vm8, %v1015_v22  ;;  %1338 = vmatprep.mubr.msk.f32.mxu1 %vm1532_vm7, %v1531_v4 }
 0x179   : > { %1332 = vmatprep.subr.mxu1 %v1531_v4 }
 0x17b   : > { %v1307_v5 = vld [vmem:[#allocation3] ss:$0 sm:$0xff] }
 0x17c   : > { %v1010_v9 = vsel %vm1009_vm6, %v1002_v8, %v1307_v5  ;;  %1333 = vmatpush3.xpose.msk.msra.mxu1 %vm1094_vm8, %v1014_v13 }
 0x17d   : > { %1328 = vmatmul.mubr.msk.f32.vlgmr.msra.gmra.mxu0 %vm1016_vm5, %v1010_v9  ;;  %1334 = vmatprep.subr.mxu1 %v1531_v4 }
 0x180   : > { %1335 = vmatpush3.xpose.msk.msra.mxu1 %vm1094_vm8, %v1013_v11 }
 0x181   : > { %1336 = vmatprep.subr.mxu1 %v1531_v4 }
 0x184   : > { %1337 = vmatpush3.xpose.msk.msra.mxu1 %vm1094_vm8, %v1012_v20 }
 0x23d   : > { %v1089_v23 = vpop.f32.mrf.mxu0 }
 0x23e   : > { %v1093_v24 = vmax.f32 %v1089_v23, 0.0 }
 0x23f   : > { %v1329_v14 = vpop.f32.mrf.mxu0 }
 0x240   : > { %1339 = vmatmul.mubr.msk.f32.vlgmr.msra.gmra.mxu1 %vm1094_vm8, %v1093_v24 }
 0x300   : > { %v1176_v15 = vpop.f32.mrf.mxu1 }
 0x301   : > { %v1181_v25 = vrot.slane %v1176_v15, 1 }
 0x302   : > { %v1340_v26 = vpop.f32.mrf.mxu1 }
 0x303   : > { %v1183_v16 = vadd.f32 %v1181_v25, %v1176_v15 }
 0x305   : > { %v1184_v17 = vsub.f32 0.0, %v1183_v16 }
 0x307   : > { %v1185_v18 = vmul.f32 1.442695, %v1184_v17 }
 0x309   : > { %1423 = vpow2.f32 %v1185_v18 }
 0x316   : > { %v1424_v27 = vpop.eup %1423 }
 0x317   : > { %v1187_v19 = vadd.f32 1.0, %v1424_v27 }
 0x319   : > { %1425 = vrcp.f32 %v1187_v19 }
 0x326   : > { %v1426_v21 = vpop.eup %1425 }
 0x327   : > { %v1193_v28 = vrot.slane %v1426_v21, %v1659_v12 }
 0x329   : > { %1203 = vbcast.lane.b32.xlu1 %v1193_v28, 272  ;;  %1195 = vbcast.lane.b32.xlu0 %v1193_v28, 256 }
 0x32d   : > { %1207 = vbcast.lane.b32.xlu1 %v1193_v28, 280  ;;  %1199 = vbcast.lane.b32.xlu0 %v1193_v28, 264 }
 0x39b   : > { %v1204_v29 = vpop.permute.xlu1 %1203  ;;  %v1196_v30 = vpop.permute.xlu0 %1195 }
 0x39c   : > { %1212 = vst.msk [vmem:[%s1652_s20 + $0x10] sm:$0xff] %vm1209_vm9, %v1204_v29  ;;  %1210 = vst.msk [vmem:[%s1652_s20] sm:$0xff] %vm1209_vm9, %v1196_v30 }
 0x39f   : > { %v1208_v31 = vpop.permute.xlu1 %1207  ;;  %v1200_v32 = vpop.permute.xlu0 %1199 }
 0x3a0   : > { %1213 = vst.msk [vmem:[%s1652_s20 + $0x18] sm:$0xff] %vm1209_vm9, %v1208_v31  ;;  %1211 = vst.msk [vmem:[%s1652_s20 + $0x8] sm:$0xff] %vm1209_vm9, %v1200_v32 }
 0x3a1 PF: > { %s16_s19 = sadd.s32 1, %s1521_s19   ;;  %s1871_s12 = smov %s1497_s13 }
 0x3a2   : > { %p13_p11 = scmp.ge.s32.totalorder %s16_s19, 6   ;;  %s1872_s13 = smov %s1501_s14 }
 0x3a3   : > { %s1873_s14 = smov %s1620_s5  ;;  %s1874_s15 = smov %s1513_s17 }
 0x3a4   : > { %s1875_s16 = smov %s1517_s18  ;;  %s1876_s17 = smov %s1879_s21 }
 0x3a5   : > { %s1877_s18 = smov %s1883_s22  ;;  %15 = sbr.rel (!%p13_p11) target bundleno = 5 (0x5), region = 80 }
 0x3aa   :  { %1235 = vsyncpa [#allocation5], 1 }
 0x3ab   :  { %1237 = vsyncpa [#allocation5 + $0x1], 1 }

</bundles_post_ra>
